<compile_context>
chip_gen: v5e
topology: v5e:2x2
jax: 0.10.0
libtpu: 0.0.40
codegen_flags: <defaults>
</compile_context>

<pallas_src>
import jax
import jax.numpy as jnp
from jax.experimental import pallas as pl
from jax.experimental.pallas import tpu as pltpu


def time_embedding_kernel(x_ref, w1_ref, b1_ref, w2_ref, b2_ref, o_ref):
    compute_dtype = w1_ref.dtype  # weight-streaming dtype (bf16 when prepared)

    # linear_1 (recomputed per output-column tile: tiny, fully hidden under
    # the w2 DMA stream, and keeps every grid step independent so the column
    # axis can be 'parallel' / megacore-sharded on v7x).
    h = jnp.dot(x_ref[...].astype(compute_dtype), w1_ref[...],
                preferred_element_type=jnp.float32)
    h = h + b1_ref[...]                      # f32 bias add

    # SiLU in f32: exp + reciprocal land on the EUP slot (idle next to the
    # MXU / DMA).  Exact reciprocal is free in this memory-bound regime and
    # matches x*sigmoid(x) more closely than the approx path.
    h = h * pl.reciprocal(1.0 + jnp.exp(-h), approx=False)

    # linear_2: one (hidden, TN) column tile of w2 per grid step.
    out = jnp.dot(h.astype(compute_dtype), w2_ref[...],
                  preferred_element_type=jnp.float32)
    o_ref[...] = (out + b2_ref[...]).astype(o_ref.dtype)


def prepare_time_embedding_params(w1, b1, w2, b2, *, compute_dtype=jnp.bfloat16):
    """One-time (init-time) parameter preparation.

    Casting the weights to the bf16 streaming dtype HERE -- rather than inside
    the per-call wrapper -- avoids re-reading and re-writing the f32 weights
    from HBM on every invocation (~3x the kernel's own weight HBM traffic at
    SD sizes).  Weights are expected pre-transposed to (in, out).
    """
    n_embed, hidden = w1.shape
    assert w2.shape == (hidden, hidden)
    return dict(
        w1=jnp.asarray(w1, compute_dtype),
        b1=jnp.asarray(b1, jnp.float32).reshape(1, hidden),
        w2=jnp.asarray(w2, compute_dtype),
        b2=jnp.asarray(b2, jnp.float32).reshape(1, hidden),
    )


def _pick_tn(hidden, weight_itemsize, max_tile_bytes=8 << 20):
    """Lane-dense w2 column-tile width.

    Prefer the smallest EVEN step count (balanced split across v7x's two
    TensorCores; near-minimal ~0.35us/step fixed overhead on single-core
    v5e/v6e) whose tile width is a multiple of 128 lanes and whose w2 tile
    fits a modest VMEM budget.  Falls back to a single full-width step for
    small/odd sizes, and to 128-wide tiles only if hidden is enormous.
    """
    if hidden % 256 != 0:
        return hidden                      # single step (covers hidden < 256 too)
    steps = 2
    while True:
        tn = hidden // steps
        if tn % 128 != 0:
            break
        if hidden * tn * weight_itemsize <= max_tile_bytes:
            return tn
        steps *= 2
    return 128


def time_embedding(x, params, *, tn=None):
    """x: (B, n_embed); params from prepare_time_embedding_params()."""
    w1, b1, w2, b2 = params["w1"], params["b1"], params["w2"], params["b2"]
    B, n_embed = x.shape
    hidden = w1.shape[1]
    assert w1.shape == (n_embed, hidden)
    assert w2.shape == (hidden, hidden)

    if tn is None:
        tn = _pick_tn(hidden, w2.dtype.itemsize)
    assert hidden % tn == 0 and (tn % 128 == 0 or tn == hidden)
    steps = hidden // tn

    # Pad batch to a sublane multiple so MXU rows / output stores are unmasked.
    B_pad = max(8, ((B + 7) // 8) * 8)
    x_p = x if B_pad == B else jnp.zeros((B_pad, n_embed), x.dtype).at[:B].set(x)

    itemsize = lambda a: a.size * a.dtype.itemsize
    # Resident set (x, w1, b1; default double-buffered -- under 2 MB even at
    # SD sizes, so we keep default buffering rather than pl.Buffered(1) for
    # maximum compatibility) + double-buffered w2/b2/out tiles + f32 temps.
    resident = (
        2 * (itemsize(x_p) + itemsize(w1) + itemsize(b1))
        + 2 * hidden * tn * w2.dtype.itemsize
        + 2 * tn * b2.dtype.itemsize
        + 2 * B_pad * tn * x.dtype.itemsize
        + B_pad * hidden * 4 + B_pad * tn * 4
    )
    # Keep headroom under v7x's 64 MiB physical VMEM: cap at 40 MiB.
    vmem_limit = int(min(40 << 20, max(32 << 20, 2 * resident)))

    cost = pl.CostEstimate(
        # linear_1 is recomputed once per grid step; linear_2 is tiled over steps.
        flops=int(2 * B_pad * n_embed * hidden * steps
                  + 2 * B_pad * hidden * hidden),
        # exp + reciprocal per hidden element, once per grid step.
        transcendentals=int(2 * B_pad * hidden * steps),
        bytes_accessed=int(itemsize(x_p) + itemsize(w1) + itemsize(w2)
                           + itemsize(b1) + itemsize(b2)
                           + B_pad * hidden * x.dtype.itemsize),
    )

    out_p = pl.pallas_call(
        time_embedding_kernel,
        out_shape=jax.ShapeDtypeStruct((B_pad, hidden), x.dtype),
        grid_spec=pltpu.PrefetchScalarGridSpec(
            num_scalar_prefetch=0,
            grid=(steps,),
            in_specs=[
                pl.BlockSpec((B_pad, n_embed), lambda j: (0, 0)),   # x  (resident)
                pl.BlockSpec((n_embed, hidden), lambda j: (0, 0)),  # w1 (resident)
                pl.BlockSpec((1, hidden), lambda j: (0, 0)),        # b1 (resident)
                pl.BlockSpec((hidden, tn), lambda j: (0, j)),       # w2 column tile
                pl.BlockSpec((1, tn), lambda j: (0, j)),            # b2 tile
            ],
            out_specs=pl.BlockSpec((B_pad, tn), lambda j: (0, j)),
        ),
        compiler_params=pltpu.CompilerParams(
            dimension_semantics=("parallel",),
            vmem_limit_bytes=vmem_limit,
        ),
        cost_estimate=cost,
    )(x_p, w1, b1, w2, b2)
    return out_p[:B]


def reference_f32(x, w1, b1, w2, b2):
    h = x @ w1 + b1
    h = h * jax.nn.sigmoid(h)
    return h @ w2 + b2


def reference_matched(x, params):
    # Same bf16-weight / f32-accumulate quantization as the kernel, exact sigmoid.
    h = jnp.dot(x.astype(params["w1"].dtype), params["w1"],
                preferred_element_type=jnp.float32) + params["b1"]
    h = h * jax.nn.sigmoid(h)
    return jnp.dot(h.astype(params["w2"].dtype), params["w2"],
                   preferred_element_type=jnp.float32) + params["b2"]


if __name__ == "__main__":
    key = jax.random.PRNGKey(0)
    n_embed = 128          # small synthetic size (real SD uses 320 -> hidden 1280)
    hidden = 4 * n_embed   # 512 -> exercises the 2-step column-tiled grid (tn=256)
    batch = 2

    k_x, k_w1, k_b1, k_w2, k_b2 = jax.random.split(key, 5)
    x = jax.random.normal(k_x, (batch, n_embed), dtype=jnp.float32)
    # Deterministic synthetic parameters (nn.Linear shapes, pre-transposed to (in, out)).
    w1 = jax.random.normal(k_w1, (n_embed, hidden), dtype=jnp.float32) * 0.05
    b1 = jax.random.normal(k_b1, (1, hidden), dtype=jnp.float32) * 0.05
    w2 = jax.random.normal(k_w2, (hidden, hidden), dtype=jnp.float32) * 0.05
    b2 = jax.random.normal(k_b2, (1, hidden), dtype=jnp.float32) * 0.05

    # One-time (init-time) bf16 weight preparation -- NOT per call.
    params = jax.block_until_ready(prepare_time_embedding_params(w1, b1, w2, b2))

    out = time_embedding(x, params)
    jax.block_until_ready(out)
    assert out.shape == (batch, hidden)

    ref_q = reference_matched(x, params)           # same bf16 quantization
    ref_f = reference_f32(x, w1, b1, w2, b2)       # PyTorch-faithful f32
    err_q = float(jnp.max(jnp.abs(out - ref_q)))
    err_f = float(jnp.max(jnp.abs(out - ref_f)))
    assert jnp.allclose(out, ref_q, atol=1e-2, rtol=1e-2), f"max err vs matched ref: {err_q}"
    assert jnp.allclose(out, ref_f, atol=5e-2, rtol=5e-2), f"max err vs f32 ref: {err_f}"
    print("KERNEL_OK")
</pallas_src>

<mosaic_0001>
module attributes {stable_mosaic.version = 11 : i64} {
  func.func @time_embedding_kernel(%arg0: i32, %arg1: memref<8x128xf32, #tpu.memory_space<vmem>>, %arg2: memref<128x512xbf16, #tpu.memory_space<vmem>>, %arg3: memref<1x512xf32, #tpu.memory_space<vmem>>, %arg4: memref<512x256xbf16, #tpu.memory_space<vmem>>, %arg5: memref<1x256xf32, #tpu.memory_space<vmem>>, %arg6: memref<8x256xf32, #tpu.memory_space<vmem>>) attributes {dimension_semantics = [#tpu.dimension_semantics<parallel>], iteration_bounds = array<i64: 2>, scalar_prefetch = 0 : i64, scratch_operands = 0 : i64, tpu.core_type = #tpu.core_type<tc>, window_params = [{pipeline_mode = #tpu.pipeline_mode<synchronous>, transform_indices = @transform_0, window_bounds = array<i64: 8, 128>}, {pipeline_mode = #tpu.pipeline_mode<synchronous>, transform_indices = @transform_1, window_bounds = array<i64: 128, 512>}, {pipeline_mode = #tpu.pipeline_mode<synchronous>, transform_indices = @transform_2, window_bounds = array<i64: 1, 512>}, {transform_indices = @transform_3, window_bounds = array<i64: 512, 256>}, {transform_indices = @transform_4, window_bounds = array<i64: 1, 256>}, {transform_indices = @transform_5, window_bounds = array<i64: 8, 256>}]} {
    %c0 = arith.constant 0 : index
    %c0_0 = arith.constant 0 : index
    %0 = vector.load %arg1[%c0, %c0_0] : memref<8x128xf32, #tpu.memory_space<vmem>>, vector<8x128xf32>
    %1 = arith.truncf %0 : vector<8x128xf32> to vector<8x128xbf16>
    %c0_1 = arith.constant 0 : index
    %c0_2 = arith.constant 0 : index
    %2 = vector.load %arg2[%c0_1, %c0_2] : memref<128x512xbf16, #tpu.memory_space<vmem>>, vector<128x512xbf16>
    %cst = arith.constant dense<0.000000e+00> : vector<8x512xf32>
    %3 = tpu.matmul %1, %2, %cst {dimension_numbers = #tpu.dot_dimension_numbers<[1], [0], [0], [1], [0, 0, 1, 1], [], []>} : vector<8x128xbf16>, vector<128x512xbf16>, vector<8x512xf32> -> vector<8x512xf32>
    %c0_3 = arith.constant 0 : index
    %c0_4 = arith.constant 0 : index
    %4 = vector.load %arg3[%c0_3, %c0_4] : memref<1x512xf32, #tpu.memory_space<vmem>>, vector<1x512xf32>
    %5 = vector.broadcast %4 : vector<1x512xf32> to vector<8x512xf32>
    %6 = arith.addf %3, %5 : vector<8x512xf32>
    %cst_5 = arith.constant 0.000000e+00 : f32
    %7 = vector.broadcast %cst_5 : f32 to vector<8x512xf32>
    %8 = arith.subf %7, %6 : vector<8x512xf32>
    %9 = math.exp %8 : vector<8x512xf32>
    %cst_6 = arith.constant 1.000000e+00 : f32
    %10 = vector.broadcast %cst_6 : f32 to vector<8x512xf32>
    %11 = arith.addf %10, %9 : vector<8x512xf32>
    %12 = tpu.reciprocal %11 : vector<8x512xf32> -> vector<8x512xf32>
    %13 = arith.mulf %6, %12 : vector<8x512xf32>
    %14 = arith.truncf %13 : vector<8x512xf32> to vector<8x512xbf16>
    %c0_7 = arith.constant 0 : index
    %c0_8 = arith.constant 0 : index
    %15 = vector.load %arg4[%c0_7, %c0_8] : memref<512x256xbf16, #tpu.memory_space<vmem>>, vector<512x256xbf16>
    %cst_9 = arith.constant dense<0.000000e+00> : vector<8x256xf32>
    %16 = tpu.matmul %14, %15, %cst_9 {dimension_numbers = #tpu.dot_dimension_numbers<[1], [0], [0], [1], [0, 0, 1, 1], [], []>} : vector<8x512xbf16>, vector<512x256xbf16>, vector<8x256xf32> -> vector<8x256xf32>
    %c0_10 = arith.constant 0 : index
    %c0_11 = arith.constant 0 : index
    %17 = vector.load %arg5[%c0_10, %c0_11] : memref<1x256xf32, #tpu.memory_space<vmem>>, vector<1x256xf32>
    %18 = vector.broadcast %17 : vector<1x256xf32> to vector<8x256xf32>
    %19 = arith.addf %16, %18 : vector<8x256xf32>
    %c0_12 = arith.constant 0 : index
    %c0_13 = arith.constant 0 : index
    %20 = vector.load %arg6[%c0_12, %c0_13] : memref<8x256xf32, #tpu.memory_space<vmem>>, vector<8x256xf32>
    tpu.vector_store %arg6[%c0_12, %c0_13], %19 {strides = array<i32>} : memref<8x256xf32, #tpu.memory_space<vmem>>, vector<8x256xf32>,
    return
  }
  func.func @transform_0(%arg0: i32) -> (i32, i32) {
    %c0_i32 = arith.constant 0 : i32
    %c0_i32_0 = arith.constant 0 : i32
    %c0_i32_1 = arith.constant 0 : i32
    return %c0_i32, %c0_i32_0 : i32, i32
  }
  func.func @transform_1(%arg0: i32) -> (i32, i32) {
    %c0_i32 = arith.constant 0 : i32
    %c0_i32_0 = arith.constant 0 : i32
    %c0_i32_1 = arith.constant 0 : i32
    return %c0_i32, %c0_i32_0 : i32, i32
  }
  func.func @transform_2(%arg0: i32) -> (i32, i32) {
    %c0_i32 = arith.constant 0 : i32
    %c0_i32_0 = arith.constant 0 : i32
    %c0_i32_1 = arith.constant 0 : i32
    return %c0_i32, %c0_i32_0 : i32, i32
  }
  func.func @transform_3(%arg0: i32) -> (i32, i32) {
    %c0_i32 = arith.constant 0 : i32
    %c0_i32_0 = arith.constant 0 : i32
    return %c0_i32, %arg0 : i32, i32
  }
  func.func @transform_4(%arg0: i32) -> (i32, i32) {
    %c0_i32 = arith.constant 0 : i32
    %c0_i32_0 = arith.constant 0 : i32
    return %c0_i32, %arg0 : i32, i32
  }
  func.func @transform_5(%arg0: i32) -> (i32, i32) {
    %c0_i32 = arith.constant 0 : i32
    %c0_i32_0 = arith.constant 0 : i32
    return %c0_i32, %arg0 : i32, i32
  }
}

</mosaic_0001>

<bundles_post_ra>
// kernel: tpu_custom_call.1
= control target key start
LH: loop header
LB: loop body
LE: loop exit
PB: predicated region body
PF: predicated region fallthrough
CT: control target
= control target key end

     0   :  { %s2550_s0 = inlined_call_operand.hbm [shape: f32[8,128], index: 0, kind: input, shape index: {}]   ;;  %s2551_s1 = inlined_call_operand.hbm [shape: bf16[128,512], index: 1, kind: input, shape index: {}]   ;;  %s2552_s2 = inlined_call_operand.hbm [shape: f32[1,512], index: 2, kind: input, shape index: {}]   ;;  %s2553_s3 = inlined_call_operand.hbm [shape: bf16[512,512], index: 3, kind: input, shape index: {}]   ;;  %s2554_s4 = inlined_call_operand.hbm [shape: f32[1,512], index: 4, kind: input, shape index: {}]   ;;  %s2555_s5 = inlined_call_operand.hbm [shape: f32[8,512], index: 5, kind: output, shape index: {}]  }
   0x1   :  { %2561 = sst [smem:[#allocation18_spill]] %s2550_s0 }
   0x2   :  { %2562 = sst [smem:[#allocation19_spill]] %s2551_s1 }
   0x3   :  { %2563 = sst [smem:[#allocation20_spill]] %s2553_s3 }
   0x4   :  { %10 = vsyncpa [#allocation3], 0 }
   0x5   :  { %11 = vsyncpa [#allocation6], 0 }
   0x6   :  { %12 = vsyncpa [#allocation9], 0 }
   0x7   :  { %14 = vsyncpa [#allocation9 + $0x1], 0 }
   0x8   :  { %15 = vsyncpa [#allocation4], 0 }
   0x9   :  { %17 = vsyncpa [#allocation4 + $0x1], 0  ;;  %s2170_s18 = smov 0   ;;  %s2172_s19 = smov 0  }
   0xa   :  { %s2174_s20 = smov 0   ;;  %s2176_s21 = smov 0  }
   0xb LB: > { %s2191_s22 = sadd.s32 4294967295, %s2131_s21   ;;  %s1300_s23 = sadd.s32 4294967294, %s2131_s21   ;;  %s2131_s21 = sphi %s2176_s21, %s2584_s21   ;;  %s2127_s20 = sphi %s2174_s20, %s2588_s20   ;;  %s2123_s19 = sphi %s2172_s19, %s2587_s19   ;;  %s2119_s18 = sphi %s2170_s18, %s2586_s18  }
   0xc   : > { %p106_p0 = scmp.ne.s32.totalorder %s2123_s19, %s2119_s18  ;;  %p2558_p1 = scmp.eq.s32.totalorder %s2191_s22, 0 }
   0xd   : > { %p156_p2 = scmp.eq.s32.totalorder %s2191_s22, 1  ;;  %p162_p3 = scmp.eq.s32.totalorder %s1300_s23, 1 }
   0xe   : > { %p2200_p4 = por %p2558_p1, %p106_p0  ;;  %p1301_p5 = scmp.ge.s32.totalorder %s2131_s21, 1 }
   0xf   : > { %p2205_p6 = por %p162_p3, %p106_p0  ;;  %p169_p7 = scmp.lt.s32.totalorder %s2131_s21, 3 }
  0x10   : > { %s2566_s1 = sld [smem:[#allocation19_spill]]  ;;  %s2133_s30 = smov [#allocation5]  }
  0x11   : > { %p2213_p8 = pnand %p1301_p5, %p169_p7  ;;  %s194_s6 = sshll.u32 %s2133_s30, 4  ;;  %s195_s6 = int_to_ptr.vmem [resolvable:$true] %s194_s6 }
  0x12   : > { %s2227_s8 = sadd.s32 1, %s2131_s21   ;;  %s2556_s9 = smov 256  }
  0x13   : > { %p1823_p9 = pneg %p2213_p8  ;;  %2569 = sst [smem:[#allocation16_spill]] %s2227_s8 }
  0x14   : > { %s2135_s10 = smov 16   ;;  %s90_s11 = ssub.s32 %s2131_s21, %s2227_s8 }
  0x15   : > { %p2221_p10 = pnand %p1823_p9, %p2558_p1  ;;  %s93_s12 = sadd.s32 1, %s2127_s20 }
  0x16   : > { %s192_s28 = sshll.u32 %s2566_s1, 4  ;;  %p91_p12 = scmp.eq.s32.totalorder %s90_s11, 0  ;;  %s193_s28 = int_to_ptr.hbm [resolvable:$true] %s192_s28 }
  0x17   : > { %1829 = dma.hbm_to_vmem [thread:$0]  (!%p2221_p10), %s193_s28, 4096, %s195_s6, [#allocation6], %s2556_s9, %s2556_s9, %s2135_s10  }
  0x18   : > { %p100_p13 = scmp.ne.s32.totalorder %s2127_s20, %s2123_s19  ;;  %p101_p0 = scmp.eq.s32.totalorder %s2131_s21, 0 }
  0x19   : > { %p1847_p3 = scmp.lt.s32.totalorder %s2131_s21, 2  ;;  %s220_s15 = sand.u32 1, %s2131_s21  }
  0x1a   : > { %s2241_s13 = scalar_select %p91_p12, %s2127_s20, %s93_s12  }
  0x1b   : > { %p102_p5 = por %p101_p0, %p100_p13  ;;  %p2245_p7 = por %p156_p2, %p100_p13 }
  0x1c   : > { %2570 = sst [smem:[#allocation17_spill]] %s2241_s13  ;;  %s2557_s16 = sand.u32 1, %s2127_s20  }
  0x1d   : > { %s1306_s17 = sshll.u32 %s2557_s16, 9  ;;  %s1707_s23 = sshll.u32 %s2131_s21, 3 }
  0x1e   : > { %s2572_s3 = sld [smem:[#allocation20_spill]]  ;;  %s224_s30 = scalar_lea.vmem [#allocation8], %s1306_s17 }
  0x1f   : > { %s232_s6 = sshll.u32 %s224_s30, 4  ;;  %p2259_p9 = pnand %p1847_p3, %p102_p5  ;;  %s233_s6 = int_to_ptr.vmem [resolvable:$true] %s232_s6 }
  0x20   : > { %s2574_s0 = sld [smem:[#allocation18_spill]]  ;;  %s2266_s1 = scalar_lea.sflag [#allocation9], %s220_s15 }
  0x21   : > { %p1941_p12 = pneg %p2259_p9 }
  0x24   : > { %s229_s28 = scalar_lea.hbm %s2572_s3, %s1707_s23 }
  0x25   : > { %s230_s10 = sshll.u32 %s229_s28, 4  ;;  %s1944_s28 = scalar_lea.hbm %s2572_s3, 1024  ;;  %s231_s10 = int_to_ptr.hbm [resolvable:$true] %s230_s10 }
  0x26   : > { %s181_s16 = sshll.u32 %s2574_s0, 4  ;;  %s1937_s26 = sshra.s32 %s231_s10, 4  ;;  %s1938_s26 = int_to_ptr.hbm [resolvable:$true] %s1937_s26  ;;  %s182_s16 = int_to_ptr.hbm [resolvable:$true] %s181_s16 }
  0x27   : > { %s1939_s17 = scalar_lea.hbm %s1938_s26, 512  ;;  %p1945_p3 = scmp.lt.s32.totalorder %s1938_s26, %s2572_s3 }
  0x28   : > { %p1940_p2 = scmp.ne.s32.totalorder %s1938_s26, %s1939_s17  ;;  %p1946_p5 = scmp.lt.s32.totalorder %s1944_s28, %s1939_s17 }
  0x2a   : > { %p1942_p13 = pnand %p1941_p12, %p1940_p2  ;;  %p1947_p11 = por %p1946_p5, %p1945_p3 }
  0x2c   : > { %p1943_p0 = pneg %p1942_p13 }
  0x2e   : > { %p1948_p1 = pnand %p1947_p11, %p1943_p0 }
  0x30   : > { %1951 = shalt.err (!%p1948_p1)
}
  0x31   : > { %s2136_s15 = smov 128   ;;  %s2137_s12 = smov 8  }
  0x32   : > { %s2575_s0 = smov 256   ;;  %s2138_s23 = smov [#allocation2]  }
  0x33   : > { %1836 = dma.hbm_to_vmem [thread:$0]  (!%p2259_p9), %s231_s10, 8192, %s233_s6, %s2266_s1, %s2575_s0, %s2136_s15, %s2137_s12  }
  0x34   : > { %s183_s27 = sshll.u32 %s2138_s23, 4  ;;  %s207_s17 = sshll.u32 %s2552_s2, 4  ;;  %s184_s27 = int_to_ptr.vmem [resolvable:$true] %s183_s27  ;;  %s208_s17 = int_to_ptr.hbm [resolvable:$true] %s207_s17 }
  0x35   : > { %1826 = dma.hbm_to_vmem [thread:$0]  (!%p2221_p10), %s182_s16, 128, %s184_s27, [#allocation3]  }
  0x36   : > { %s2576_s28 = sand.u32 1, %s2127_s20   ;;  %s2139_s3 = smov [#allocation7]  }
  0x37   : > { %s1309_s30 = sshll.u32 %s2576_s28, 1  ;;  %s209_s13 = sshll.u32 %s2139_s3, 4  ;;  %s210_s13 = int_to_ptr.vmem [resolvable:$true] %s209_s13 }
  0x38   : > { %s1310_s8 = sshll.u32 %s2131_s21, 1  ;;  %s246_s15 = scalar_lea.vmem [#allocation10], %s1309_s30 }
  0x39   : > { %1832 = dma.hbm_to_vmem [thread:$0]  (!%p2221_p10), %s208_s17, 64, %s210_s13, [#allocation6]  }
  0x3a   : > { %s250_s10 = scalar_lea.hbm %s2554_s4, %s1310_s8  ;;  %s254_s12 = sshll.u32 %s246_s15, 4  ;;  %s255_s12 = int_to_ptr.vmem [resolvable:$true] %s254_s12 }
  0x3b   : > { %s252_s23 = sshll.u32 %s250_s10, 4  ;;  %s2034_s13 = scalar_lea.hbm %s2554_s4, 4  ;;  %s253_s23 = int_to_ptr.hbm [resolvable:$true] %s252_s23 }
  0x3c   : > { %s2027_s9 = sshra.s32 %s253_s23, 4  ;;  %s2028_s9 = int_to_ptr.hbm [resolvable:$true] %s2027_s9 }
  0x3d   : > { %s2029_s16 = scalar_lea.hbm %s2028_s9, 2  ;;  %p2035_p10 = scmp.lt.s32.totalorder %s2028_s9, %s2554_s4 }
  0x3e   : > { %p2030_p1 = scmp.ne.s32.totalorder %s2028_s9, %s2029_s16  ;;  %p2036_p13 = scmp.lt.s32.totalorder %s2034_s13, %s2029_s16 }
  0x40   : > { %p2032_p11 = pnand %p2030_p1, %p1941_p12  ;;  %p2037_p0 = por %p2036_p13, %p2035_p10 }
  0x42   : > { %p2033_p2 = pneg %p2032_p11 }
  0x44   : > { %p2038_p3 = pnand %p2037_p0, %p2033_p2 }
  0x46   : > { %2041 = shalt.err (!%p2038_p3)
}
  0x47   : > { %1839 = dma.hbm_to_vmem [thread:$0]  (!%p2259_p9), %s253_s23, 32, %s255_s12, %s2266_s1  }
  0x48   : > { %263 = sbr.rel (%p2213_p8) target bundleno = 447 (0x1bf), region = 40  ;;  %p2577_p12 = scmp.eq.s32.totalorder (!%p2213_p8), %s2191_s22, 0 }
  0x4d   : > { %2102 = dma.done.wait (%p2577_p12), [#allocation3], 128   ;;  %p2578_p5 = pmov %p2577_p12 }
  0x4f   : > { %2104 = vsyncadd (%p2578_p5), [#allocation3], 4294967168  ;;  %p2579_p1 = pmov %p2578_p5 }
  0x51   : > { %2106 = dma.done.wait (%p2579_p1), [#allocation6], 4160   ;;  %p2580_p11 = pmov %p2579_p1 }
  0x52   : > { %s280_s8 = sand.u32 1, %s2191_s22   ;;  %s2320_s1 = sand.u32 1, %s2123_s19  }
  0x53   : > { %2108 = vsyncadd (%p2580_p11), [#allocation6], 4294963136  ;;  %s1315_s29 = sshll.u32 %s2320_s1, 9  ;;  %s281_s11 = scalar_lea.sflag [#allocation9], %s280_s8 }
  0x54   : > { %s2323_s17 = scalar_lea.vmem [#allocation8], %s1315_s29 }
  0x55   : > { %2110 = dma.done.wait (%p2200_p4), %s281_s11, 8224  }
  0x56   : > { %2112 = vsyncadd (%p2200_p4), %s281_s11, 4294959072  ;;  %v1432_v0 = vld [vmem:[#allocation5 + $0xe0] sm:$0xf]  ;;  %v1738_v1 = vld [vmem:[#allocation5 + $0xec] sm:$0xf0]  ;;  %s1316_s24 = sshll.u32 %s2320_s1, 1 }
  0x57   : > { %v1736_v2 = vld [vmem:[#allocation5 + $0xe4] sm:$0xf]  ;;  %v1433_v3 = vor.u32 %v1738_v1, %v1432_v0  ;;  %v1434_v4 = vld [vmem:[#allocation5 + $0xf0] sm:$0xf0]  ;;  %v1440_v5 = vld [vmem:[#allocation5 + $0xe8] sm:$0xf] }
  0x58   : > { %v1739_v6 = vld [vmem:[#allocation5 + $0xf4] sm:$0xf0]  ;;  %v1437_v7 = vor.u32 %v1736_v2, %v1434_v4  ;;  %v1737_v9 = vld [vmem:[#allocation5 + $0xec] sm:$0xf]  ;;  %v1442_v10 = vld [vmem:[#allocation5 + $0xf8] sm:$0xf0] }
  0x59   : > { %v1441_v8 = vor.u32 %v1739_v6, %v1440_v5  ;;  %v1416_v11 = vld [vmem:[#allocation5 + $0xc0] sm:$0xf]  ;;  %534 = vmatpush.bf16.msra.mxu0 %v1433_v3  ;;  %v1445_v12 = vor.u32 %v1737_v9, %v1442_v10  ;;  %v1734_v13 = vld [vmem:[#allocation5 + $0xcc] sm:$0xf0]  ;;  %v1732_v14 = vld [vmem:[#allocation5 + $0xc4] sm:$0xf] }
  0x5a   : > { %v1418_v15 = vld [vmem:[#allocation5 + $0xd0] sm:$0xf0]  ;;  %547 = vmatpush.bf16.msra.mxu1 %v1437_v7  ;;  %v1417_v16 = vor.u32 %v1734_v13, %v1416_v11  ;;  %v1424_v18 = vld [vmem:[#allocation5 + $0xc8] sm:$0xf]  ;;  %v1735_v19 = vld [vmem:[#allocation5 + $0xd4] sm:$0xf0] }
  0x5b   : > { %560 = vmatpush.bf16.msra.mxu2 %v1441_v8  ;;  %v1421_v17 = vor.u32 %v1732_v14, %v1418_v15  ;;  %v1733_v20 = vld [vmem:[#allocation5 + $0xcc] sm:$0xf]  ;;  %573 = vmatpush.bf16.msra.mxu3 %v1445_v12  ;;  %v1425_v21 = vor.u32 %v1735_v19, %v1424_v18  ;;  %v1426_v22 = vld [vmem:[#allocation5 + $0xd8] sm:$0xf0]  ;;  %v1400_v23 = vld [vmem:[#allocation5 + $0xa0] sm:$0xf] }
  0x5c   : > { %v1730_v24 = vld [vmem:[#allocation5 + $0xac] sm:$0xf0]  ;;  %v1429_v25 = vor.u32 %v1733_v20, %v1426_v22  ;;  %v1728_v26 = vld [vmem:[#allocation5 + $0xa4] sm:$0xf]  ;;  %v1402_v27 = vld [vmem:[#allocation5 + $0xb0] sm:$0xf0] }
  0x5d   : > { %v1408_v28 = vld [vmem:[#allocation5 + $0xa8] sm:$0xf]  ;;  %535 = vmatpush.bf16.msra.mxu0 %v1417_v16  ;;  %v1401_v29 = vor.u32 %v1730_v24, %v1400_v23  ;;  %v1731_v30 = vld [vmem:[#allocation5 + $0xb4] sm:$0xf0]  ;;  %v1729_v31 = vld [vmem:[#allocation5 + $0xac] sm:$0xf]  ;;  %v1405_v33 = vor.u32 %v1728_v26, %v1402_v27 }
  0x5e   : > { %v1410_v32 = vld [vmem:[#allocation5 + $0xb8] sm:$0xf0]  ;;  %548 = vmatpush.bf16.msra.mxu1 %v1421_v17  ;;  %v1409_v34 = vor.u32 %v1731_v30, %v1408_v28  ;;  %v1384_v35 = vld [vmem:[#allocation5 + $0x80] sm:$0xf]  ;;  %v1726_v36 = vld [vmem:[#allocation5 + $0x8c] sm:$0xf0] }
  0x5f   : > { %561 = vmatpush.bf16.msra.mxu2 %v1425_v21  ;;  %v1724_v37 = vld [vmem:[#allocation5 + $0x84] sm:$0xf]  ;;  %574 = vmatpush.bf16.msra.mxu3 %v1429_v25  ;;  %v1413_v38 = vor.u32 %v1729_v31, %v1410_v32  ;;  %v1386_v39 = vld [vmem:[#allocation5 + $0x90] sm:$0xf0]  ;;  %v1392_v40 = vld [vmem:[#allocation5 + $0x88] sm:$0xf]  ;;  %v1385_v44 = vor.u32 %v1726_v36, %v1384_v35 }
  0x60   : > { %v1727_v41 = vld [vmem:[#allocation5 + $0x94] sm:$0xf0]  ;;  %v1725_v42 = vld [vmem:[#allocation5 + $0x8c] sm:$0xf]  ;;  %v1394_v43 = vld [vmem:[#allocation5 + $0x98] sm:$0xf0]  ;;  %v1389_v45 = vor.u32 %v1724_v37, %v1386_v39 }
  0x61   : > { %536 = vmatpush.bf16.msra.mxu0 %v1401_v29  ;;  %v1393_v46 = vor.u32 %v1727_v41, %v1392_v40  ;;  %v1368_v47 = vld [vmem:[#allocation5 + $0x60] sm:$0xf]  ;;  %v1722_v48 = vld [vmem:[#allocation5 + $0x6c] sm:$0xf0]  ;;  %v1720_v49 = vld [vmem:[#allocation5 + $0x64] sm:$0xf]  ;;  %v1397_v50 = vor.u32 %v1725_v42, %v1394_v43 }
  0x62   : > { %549 = vmatpush.bf16.msra.mxu1 %v1405_v33  ;;  %v1370_v51 = vld [vmem:[#allocation5 + $0x70] sm:$0xf0]  ;;  %v1376_v52 = vld [vmem:[#allocation5 + $0x68] sm:$0xf]  ;;  %v1723_v53 = vld [vmem:[#allocation5 + $0x74] sm:$0xf0]  ;;  %v1369_v56 = vor.u32 %v1722_v48, %v1368_v47 }
  0x63   : > { %562 = vmatpush.bf16.msra.mxu2 %v1409_v34  ;;  %575 = vmatpush.bf16.msra.mxu3 %v1413_v38  ;;  %v1721_v54 = vld [vmem:[#allocation5 + $0x6c] sm:$0xf]  ;;  %v1378_v55 = vld [vmem:[#allocation5 + $0x78] sm:$0xf0]  ;;  %v1373_v57 = vor.u32 %v1720_v49, %v1370_v51  ;;  %v1377_v58 = vor.u32 %v1723_v53, %v1376_v52  ;;  %v1352_v59 = vld [vmem:[#allocation5 + $0x40] sm:$0xf] }
  0x64   : > { %v1718_v60 = vld [vmem:[#allocation5 + $0x4c] sm:$0xf0]  ;;  %v1716_v61 = vld [vmem:[#allocation5 + $0x44] sm:$0xf]  ;;  %v1381_v62 = vor.u32 %v1721_v54, %v1378_v55  ;;  %v1354_v63 = vld [vmem:[#allocation5 + $0x50] sm:$0xf0] }
  0x65   : > { %537 = vmatpush.bf16.msra.mxu0 %v1385_v44  ;;  %v1360_v0 = vld [vmem:[#allocation5 + $0x48] sm:$0xf]  ;;  %v1719_v1 = vld [vmem:[#allocation5 + $0x54] sm:$0xf0]  ;;  %v1717_v2 = vld [vmem:[#allocation5 + $0x4c] sm:$0xf]  ;;  %v1353_v4 = vor.u32 %v1718_v60, %v1352_v59  ;;  %v1357_v5 = vor.u32 %v1716_v61, %v1354_v63 }
  0x66   : > { %550 = vmatpush.bf16.msra.mxu1 %v1389_v45  ;;  %v1362_v3 = vld [vmem:[#allocation5 + $0x58] sm:$0xf0]  ;;  %v1361_v6 = vor.u32 %v1719_v1, %v1360_v0  ;;  %v1336_v7 = vld [vmem:[#allocation5 + $0x20] sm:$0xf]  ;;  %v1714_v8 = vld [vmem:[#allocation5 + $0x2c] sm:$0xf0] }
  0x67   : > { %563 = vmatpush.bf16.msra.mxu2 %v1393_v46  ;;  %576 = vmatpush.bf16.msra.mxu3 %v1397_v50  ;;  %v1712_v9 = vld [vmem:[#allocation5 + $0x24] sm:$0xf]  ;;  %v1365_v10 = vor.u32 %v1717_v2, %v1362_v3  ;;  %v1338_v11 = vld [vmem:[#allocation5 + $0x30] sm:$0xf0]  ;;  %v1344_v12 = vld [vmem:[#allocation5 + $0x28] sm:$0xf]  ;;  %v1337_v16 = vor.u32 %v1714_v8, %v1336_v7 }
  0x68   : > { %v1715_v13 = vld [vmem:[#allocation5 + $0x34] sm:$0xf0]  ;;  %v1713_v14 = vld [vmem:[#allocation5 + $0x2c] sm:$0xf]  ;;  %v1346_v15 = vld [vmem:[#allocation5 + $0x38] sm:$0xf0]  ;;  %v1341_v18 = vor.u32 %v1712_v9, %v1338_v11 }
  0x69   : > { %538 = vmatpush.bf16.msra.mxu0 %v1369_v56  ;;  %v1320_v17 = vld [vmem:[#allocation5] sm:$0xf]  ;;  %v1345_v19 = vor.u32 %v1715_v13, %v1344_v12  ;;  %v1710_v20 = vld [vmem:[#allocation5 + $0xc] sm:$0xf0]  ;;  %v1708_v21 = vld [vmem:[#allocation5 + $0x4] sm:$0xf]  ;;  %v1349_v23 = vor.u32 %v1713_v14, %v1346_v15 }
  0x6a   : > { %551 = vmatpush.bf16.msra.mxu1 %v1373_v57  ;;  %v1322_v22 = vld [vmem:[#allocation5 + $0x10] sm:$0xf0]  ;;  %v1328_v24 = vld [vmem:[#allocation5 + $0x8] sm:$0xf]  ;;  %v1711_v25 = vld [vmem:[#allocation5 + $0x14] sm:$0xf0]  ;;  %v1321_v30 = vor.u32 %v1710_v20, %v1320_v17 }
  0x6b   : > { %564 = vmatpush.bf16.msra.mxu2 %v1377_v58  ;;  %577 = vmatpush.bf16.msra.mxu3 %v1381_v62  ;;  %v1709_v26 = vld [vmem:[#allocation5 + $0xc] sm:$0xf]  ;;  %v1330_v27 = vld [vmem:[#allocation5 + $0x18] sm:$0xf0]  ;;  %v1504_v28 = vld [vmem:[%s2323_s17 + $0x70] sm:$0xf]  ;;  %v1325_v34 = vor.u32 %v1708_v21, %v1322_v22  ;;  %v1329_v35 = vor.u32 %v1711_v25, %v1328_v24 }
  0x6c   : > { %v1755_v29 = vld [vmem:[%s2323_s17 + $0x74] sm:$0xf0]  ;;  %v1568_v32 = vld [vmem:[%s2323_s17 + $0xf0] sm:$0xf]  ;;  %v1333_v36 = vor.u32 %v1709_v26, %v1330_v27  ;;  %v1496_v38 = vld [vmem:[%s2323_s17 + $0x60] sm:$0xf] }
  0x6d   : > { %539 = vmatpush.bf16.msra.mxu0 %v1353_v4  ;;  %v330_v31 = vld [vmem:[#allocation2] sm:$0xff]  ;;  %v1505_v37 = vor.u32 %v1755_v29, %v1504_v28  ;;  %v1632_v39 = vld [vmem:[%s2323_s17 + $0x170] sm:$0xf]  ;;  %v1753_v43 = vld [vmem:[%s2323_s17 + $0x64] sm:$0xf0]  ;;  %s294_s28 = scalar_lea.vmem [#allocation10], %s1316_s24 }
  0x6e   : > { %552 = vmatpush.bf16.msra.mxu1 %v1357_v5  ;;  %v1771_v33 = vld [vmem:[%s2323_s17 + $0xf4] sm:$0xf0]  ;;  %v331_v41 = vpack.c.bf16 %v330_v31, %v330_v31  ;;  %v1696_v44 = vld [vmem:[%s2323_s17 + $0x1f0] sm:$0xf]  ;;  %v1560_v46 = vld [vmem:[%s2323_s17 + $0xe0] sm:$0xf]  ;;  %v1497_v49 = vor.u32 %v1753_v43, %v1496_v38 }
  0x6f   : > { %565 = vmatpush.bf16.msra.mxu2 %v1361_v6  ;;  %578 = vmatpush.bf16.msra.mxu3 %v1365_v10  ;;  %v1787_v40 = vld [vmem:[%s2323_s17 + $0x174] sm:$0xf0]  ;;  %v1569_v42 = vor.u32 %v1771_v33, %v1568_v32  ;;  %v1769_v47 = vld [vmem:[%s2323_s17 + $0xe4] sm:$0xf0]  ;;  %v1488_v52 = vld [vmem:[%s2323_s17 + $0x50] sm:$0xf] }
  0x70   : > { %v1803_v45 = vld [vmem:[%s2323_s17 + $0x1f4] sm:$0xf0]  ;;  %v1633_v48 = vor.u32 %v1787_v40, %v1632_v39  ;;  %v1561_v51 = vor.u32 %v1769_v47, %v1560_v46  ;;  %v1552_v54 = vld [vmem:[%s2323_s17 + $0xd0] sm:$0xf]  ;;  %v1624_v58 = vld [vmem:[%s2323_s17 + $0x160] sm:$0xf] }
  0x71   : > { %540 = vmatpush.bf16.msra.mxu0 %v1337_v16  ;;  %v1697_v50 = vor.u32 %v1803_v45, %v1696_v44  ;;  %v1751_v53 = vld [vmem:[%s2323_s17 + $0x54] sm:$0xf0]  ;;  %v1785_v59 = vld [vmem:[%s2323_s17 + $0x164] sm:$0xf0]  ;;  %v1688_v60 = vld [vmem:[%s2323_s17 + $0x1e0] sm:$0xf] }
  0x72   : > { %553 = vmatpush.bf16.msra.mxu1 %v1341_v18  ;;  %v1489_v55 = vor.u32 %v1751_v53, %v1488_v52  ;;  %v1767_v56 = vld [vmem:[%s2323_s17 + $0xd4] sm:$0xf0]  ;;  %v1625_v61 = vor.u32 %v1785_v59, %v1624_v58  ;;  %v1801_v62 = vld [vmem:[%s2323_s17 + $0x1e4] sm:$0xf0]  ;;  %v1480_v0 = vld [vmem:[%s2323_s17 + $0x40] sm:$0xf] }
  0x73   : > { %566 = vmatpush.bf16.msra.mxu2 %v1345_v19  ;;  %579 = vmatpush.bf16.msra.mxu3 %v1349_v23  ;;  %v1553_v57 = vor.u32 %v1767_v56, %v1552_v54  ;;  %v1689_v63 = vor.u32 %v1801_v62, %v1688_v60  ;;  %v1749_v1 = vld [vmem:[%s2323_s17 + $0x44] sm:$0xf0]  ;;  %v1544_v2 = vld [vmem:[%s2323_s17 + $0xc0] sm:$0xf]  ;;  %v1616_v6 = vld [vmem:[%s2323_s17 + $0x150] sm:$0xf] }
  0x74   : > { %v1481_v3 = vor.u32 %v1749_v1, %v1480_v0  ;;  %v1765_v4 = vld [vmem:[%s2323_s17 + $0xc4] sm:$0xf0]  ;;  %v1783_v7 = vld [vmem:[%s2323_s17 + $0x154] sm:$0xf0]  ;;  %v1680_v8 = vld [vmem:[%s2323_s17 + $0x1d0] sm:$0xf] }
  0x75   : > { %541 = vmatpush.bf16.msra.mxu0 %v1321_v30  ;;  %v1545_v5 = vor.u32 %v1765_v4, %v1544_v2  ;;  %v1617_v9 = vor.u32 %v1783_v7, %v1616_v6  ;;  %v1799_v10 = vld [vmem:[%s2323_s17 + $0x1d4] sm:$0xf0]  ;;  %v1472_v12 = vld [vmem:[%s2323_s17 + $0x30] sm:$0xf]  ;;  %v1608_v18 = vld [vmem:[%s2323_s17 + $0x140] sm:$0xf] }
  0x76   : > { %554 = vmatpush.bf16.msra.mxu1 %v1325_v34  ;;  %v1681_v11 = vor.u32 %v1799_v10, %v1680_v8  ;;  %v1747_v13 = vld [vmem:[%s2323_s17 + $0x34] sm:$0xf0]  ;;  %v1536_v14 = vld [vmem:[%s2323_s17 + $0xb0] sm:$0xf]  ;;  %v1781_v19 = vld [vmem:[%s2323_s17 + $0x144] sm:$0xf0] }
  0x77   : > { %567 = vmatpush.bf16.msra.mxu2 %v1329_v35  ;;  %580 = vmatpush.bf16.msra.mxu3 %v1333_v36  ;;  %v1473_v15 = vor.u32 %v1747_v13, %v1472_v12  ;;  %v1763_v16 = vld [vmem:[%s2323_s17 + $0xb4] sm:$0xf0]  ;;  %v1672_v20 = vld [vmem:[%s2323_s17 + $0x1c0] sm:$0xf]  ;;  %v1609_v21 = vor.u32 %v1781_v19, %v1608_v18  ;;  %v1797_v22 = vld [vmem:[%s2323_s17 + $0x1c4] sm:$0xf0] }
  0x78   : > { %542 = vmatmul.bf16.vlgmr.msra.gmra.mxu0 %v331_v41  ;;  %v1537_v17 = vor.u32 %v1763_v16, %v1536_v14  ;;  %v1673_v23 = vor.u32 %v1797_v22, %v1672_v20  ;;  %v1464_v24 = vld [vmem:[%s2323_s17 + $0x20] sm:$0xf]  ;;  %v1745_v25 = vld [vmem:[%s2323_s17 + $0x24] sm:$0xf0]  ;;  %v1600_v30 = vld [vmem:[%s2323_s17 + $0x130] sm:$0xf] }
  0x79   : > { %1056 = vmatpush.bf16.msrb.mxu0 %v1505_v37  ;;  %555 = vmatmul.bf16.vlgmr.msra.gmra.mxu1 %v331_v41  ;;  %v1528_v26 = vld [vmem:[%s2323_s17 + $0xa0] sm:$0xf]  ;;  %v1465_v27 = vor.u32 %v1745_v25, %v1464_v24  ;;  %v1761_v28 = vld [vmem:[%s2323_s17 + $0xa4] sm:$0xf0]  ;;  %v1779_v31 = vld [vmem:[%s2323_s17 + $0x134] sm:$0xf0] }
  0x7a   : > { %1069 = vmatpush.bf16.msrb.mxu1 %v1569_v42  ;;  %568 = vmatmul.bf16.vlgmr.msra.gmra.mxu2 %v331_v41  ;;  %v1529_v29 = vor.u32 %v1761_v28, %v1528_v26  ;;  %v1664_v32 = vld [vmem:[%s2323_s17 + $0x1b0] sm:$0xf]  ;;  %v1601_v33 = vor.u32 %v1779_v31, %v1600_v30  ;;  %v1795_v34 = vld [vmem:[%s2323_s17 + $0x1b4] sm:$0xf0]  ;;  %v1592_v42 = vld [vmem:[%s2323_s17 + $0x120] sm:$0xf] }
  0x7b   : > { %581 = vmatmul.bf16.vlgmr.msra.gmra.mxu3 %v331_v41  ;;  %1082 = vmatpush.bf16.msrb.mxu2 %v1633_v48  ;;  %v1665_v35 = vor.u32 %v1795_v34, %v1664_v32  ;;  %v1456_v36 = vld [vmem:[%s2323_s17 + $0x10] sm:$0xf]  ;;  %v1743_v37 = vld [vmem:[%s2323_s17 + $0x14] sm:$0xf0]  ;;  %v1777_v43 = vld [vmem:[%s2323_s17 + $0x124] sm:$0xf0] }
  0x7c   : > { %1095 = vmatpush.bf16.msrb.mxu3 %v1697_v50  ;;  %v1520_v38 = vld [vmem:[%s2323_s17 + $0x90] sm:$0xf]  ;;  %v1457_v39 = vor.u32 %v1743_v37, %v1456_v36  ;;  %v1759_v40 = vld [vmem:[%s2323_s17 + $0x94] sm:$0xf0]  ;;  %v1656_v44 = vld [vmem:[%s2323_s17 + $0x1a0] sm:$0xf]  ;;  %v1593_v46 = vor.u32 %v1777_v43, %v1592_v42 }
  0x7d   : > { %1057 = vmatpush.bf16.msrb.mxu0 %v1497_v49  ;;  %v1521_v41 = vor.u32 %v1759_v40, %v1520_v38  ;;  %v2380_v45 = vld [vmem:[#allocation7] sm:$0xf]  ;;  %v1793_v47 = vld [vmem:[%s2323_s17 + $0x1a4] sm:$0xf0]  ;;  %v1448_v49 = vld [vmem:[%s2323_s17] sm:$0xf] }
  0x7e   : > { %1070 = vmatpush.bf16.msrb.mxu1 %v1561_v51  ;;  %v1657_v48 = vor.u32 %v1793_v47, %v1656_v44  ;;  %v1741_v50 = vld [vmem:[%s2323_s17 + $0x4] sm:$0xf0]  ;;  %v1512_v51 = vld [vmem:[%s2323_s17 + $0x80] sm:$0xf]  ;;  %v1754_v54 = vld [vmem:[%s2323_s17 + $0x74] sm:$0xf] }
  0x7f   : > { %1083 = vmatpush.bf16.msrb.mxu2 %v1625_v61  ;;  %v1449_v52 = vor.u32 %v1741_v50, %v1448_v49  ;;  %v1757_v53 = vld [vmem:[%s2323_s17 + $0x84] sm:$0xf0]  ;;  %v1770_v58 = vld [vmem:[%s2323_s17 + $0xf4] sm:$0xf]  ;;  %v1570_v59 = vld [vmem:[%s2323_s17 + $0xf8] sm:$0xf0] }
  0x80   : > { %1096 = vmatpush.bf16.msrb.mxu3 %v1689_v63  ;;  %v1513_v56 = vor.u32 %v1757_v53, %v1512_v51  ;;  %v1584_v60 = vld [vmem:[%s2323_s17 + $0x110] sm:$0xf]  ;;  %v1573_v61 = vor.u32 %v1770_v58, %v1570_v59  ;;  %v1775_v62 = vld [vmem:[%s2323_s17 + $0x114] sm:$0xf0]  ;;  %v366_v1 = vperm.slane %v2380_v45, 0  ;;  %v367_v2 = vperm.slane %v2380_v45, 1 }
  0x81   : > { %1058 = vmatpush.bf16.msrb.mxu0 %v1489_v55  ;;  %v1506_v55 = vld [vmem:[%s2323_s17 + $0x78] sm:$0xf0]  ;;  %v1648_v63 = vld [vmem:[%s2323_s17 + $0x190] sm:$0xf]  ;;  %v1791_v0 = vld [vmem:[%s2323_s17 + $0x194] sm:$0xf0] }
  0x82   : > { %1071 = vmatpush.bf16.msrb.mxu1 %v1553_v57  ;;  %v1509_v57 = vor.u32 %v1754_v54, %v1506_v55  ;;  %v1649_v4 = vor.u32 %v1791_v0, %v1648_v63  ;;  %v1498_v6 = vld [vmem:[%s2323_s17 + $0x68] sm:$0xf0]  ;;  %v1768_v7 = vld [vmem:[%s2323_s17 + $0xe4] sm:$0xf]  ;;  %v1576_v10 = vld [vmem:[%s2323_s17 + $0x100] sm:$0xf] }
  0x83   : > { %1084 = vmatpush.bf16.msrb.mxu2 %v1617_v9  ;;  %v1562_v9 = vld [vmem:[%s2323_s17 + $0xe8] sm:$0xf0]  ;;  %v1640_v14 = vld [vmem:[%s2323_s17 + $0x180] sm:$0xf]  ;;  %v1786_v16 = vld [vmem:[%s2323_s17 + $0x174] sm:$0xf] }
  0x84   : > { %1097 = vmatpush.bf16.msrb.mxu3 %v1681_v11  ;;  %v1773_v11 = vld [vmem:[%s2323_s17 + $0x104] sm:$0xf0]  ;;  %v1565_v12 = vor.u32 %v1768_v7, %v1562_v9  ;;  %v1634_v18 = vld [vmem:[%s2323_s17 + $0x178] sm:$0xf0]  ;;  %v1802_v19 = vld [vmem:[%s2323_s17 + $0x1f4] sm:$0xf] }
  0x85   : > { %1059 = vmatpush.bf16.msrb.mxu0 %v1481_v3  ;;  %v1585_v3 = vor.u32 %v1775_v62, %v1584_v60  ;;  %v1577_v13 = vor.u32 %v1773_v11, %v1576_v10  ;;  %v1698_v20 = vld [vmem:[%s2323_s17 + $0x1f8] sm:$0xf0]  ;;  %v1766_v25 = vld [vmem:[%s2323_s17 + $0xd4] sm:$0xf]  ;;  %v1784_v32 = vld [vmem:[%s2323_s17 + $0x164] sm:$0xf] }
  0x86   : > { %1072 = vmatpush.bf16.msrb.mxu1 %v1545_v5  ;;  %v1752_v5 = vld [vmem:[%s2323_s17 + $0x64] sm:$0xf]  ;;  %v1701_v22 = vor.u32 %v1802_v19, %v1698_v20  ;;  %v1490_v24 = vld [vmem:[%s2323_s17 + $0x58] sm:$0xf0]  ;;  %v1690_v37 = vld [vmem:[%s2323_s17 + $0x1e8] sm:$0xf0] }
  0x87   : > { %1085 = vmatpush.bf16.msrb.mxu2 %v1609_v21  ;;  %v1501_v8 = vor.u32 %v1752_v5, %v1498_v6  ;;  %v1637_v21 = vor.u32 %v1786_v16, %v1634_v18  ;;  %v1554_v28 = vld [vmem:[%s2323_s17 + $0xd8] sm:$0xf0]  ;;  %v1800_v34 = vld [vmem:[%s2323_s17 + $0x1e4] sm:$0xf]  ;;  %v1482_v42 = vld [vmem:[%s2323_s17 + $0x48] sm:$0xf0] }
  0x88   : > { %1098 = vmatpush.bf16.msrb.mxu3 %v1673_v23  ;;  %v1750_v23 = vld [vmem:[%s2323_s17 + $0x54] sm:$0xf]  ;;  %v1557_v31 = vor.u32 %v1766_v25, %v1554_v28  ;;  %v1693_v40 = vor.u32 %v1800_v34, %v1690_v37  ;;  %v369_v44 = vperm.slane %v2380_v45, 3  ;;  %v1764_v47 = vld [vmem:[%s2323_s17 + $0xc4] sm:$0xf]  ;;  %s1317_s30 = sshll.u32 %s2320_s1, 4 }
  0x89   : > { %1060 = vmatpush.bf16.msrb.mxu0 %v1473_v15  ;;  %v1789_v15 = vld [vmem:[%s2323_s17 + $0x184] sm:$0xf0]  ;;  %v1782_v51 = vld [vmem:[%s2323_s17 + $0x154] sm:$0xf]  ;;  %v1474_v59 = vld [vmem:[%s2323_s17 + $0x38] sm:$0xf0] }
  0x8a   : > { %1073 = vmatpush.bf16.msrb.mxu1 %v1537_v17  ;;  %v1641_v17 = vor.u32 %v1789_v15, %v1640_v14  ;;  %v1798_v55 = vld [vmem:[%s2323_s17 + $0x1d4] sm:$0xf]  ;;  %v1780_v5 = vld [vmem:[%s2323_s17 + $0x144] sm:$0xf]  ;;  %v1610_v6 = vld [vmem:[%s2323_s17 + $0x148] sm:$0xf0] }
  0x8b   : > { %1086 = vmatpush.bf16.msrb.mxu2 %v1601_v33  ;;  %v1626_v33 = vld [vmem:[%s2323_s17 + $0x168] sm:$0xf0]  ;;  %v1746_v58 = vld [vmem:[%s2323_s17 + $0x34] sm:$0xf]  ;;  %v1796_v7 = vld [vmem:[%s2323_s17 + $0x1c4] sm:$0xf]  ;;  %v1613_v9 = vor.u32 %v1780_v5, %v1610_v6 }
  0x8c   : > { %1099 = vmatpush.bf16.msrb.mxu3 %v1665_v35  ;;  %v1629_v36 = vor.u32 %v1784_v32, %v1626_v33  ;;  %v1762_v60 = vld [vmem:[%s2323_s17 + $0xb4] sm:$0xf]  ;;  %v1477_v0 = vor.u32 %v1746_v58, %v1474_v59  ;;  %v1674_v10 = vld [vmem:[%s2323_s17 + $0x1c8] sm:$0xf0]  ;;  %v1666_v28 = vld [vmem:[%s2323_s17 + $0x1b8] sm:$0xf0] }
  0x8d   : > { %1061 = vmatpush.bf16.msrb.mxu0 %v1465_v27  ;;  %v1493_v27 = vor.u32 %v1750_v23, %v1490_v24  ;;  %v1466_v14 = vld [vmem:[%s2323_s17 + $0x28] sm:$0xf0]  ;;  %v1602_v23 = vld [vmem:[%s2323_s17 + $0x138] sm:$0xf0]  ;;  %v1742_v33 = vld [vmem:[%s2323_s17 + $0x14] sm:$0xf] }
  0x8e   : > { %1074 = vmatpush.bf16.msrb.mxu1 %v1529_v29  ;;  %v1530_v18 = vld [vmem:[%s2323_s17 + $0xa8] sm:$0xf0]  ;;  %v1458_v34 = vld [vmem:[%s2323_s17 + $0x18] sm:$0xf0]  ;;  %v1758_v37 = vld [vmem:[%s2323_s17 + $0x94] sm:$0xf] }
  0x8f   : > { %1087 = vmatpush.bf16.msrb.mxu2 %v1593_v46  ;;  %s326_s0 = scalar_lea.vmem [#allocation11], %s1317_s30  ;;  %s1804_s6 = sshll.u32 %s2191_s22, 4 }
  0x90   : > { %1100 = vmatpush.bf16.msrb.mxu3 %v1657_v48  ;;  %v1546_v48 = vld [vmem:[%s2323_s17 + $0xc8] sm:$0xf0]  ;;  %s1174_s12 = scalar_lea.hbm %s2555_s5, %s1804_s6  ;;  %s1176_s23 = sshll.u32 %s326_s0, 4  ;;  %s1177_s23 = int_to_ptr.vmem [resolvable:$true] %s1176_s23 }
  0x91   : > { %1062 = vmatpush.bf16.msrb.mxu0 %v1457_v39  ;;  %v368_v39 = vperm.slane %v2380_v45, 2  ;;  %v1549_v50 = vor.u32 %v1764_v47, %v1546_v48  ;;  %s1178_s9 = sshll.u32 %s1174_s12, 4  ;;  %s1163_s16 = scalar_lea.sflag [#allocation4], %s2320_s1  ;;  %s1179_s9 = int_to_ptr.hbm [resolvable:$true] %s1178_s9 }
  0x92   : > { %1075 = vmatpush.bf16.msrb.mxu1 %v1521_v41  ;;  %v1748_v41 = vld [vmem:[%s2323_s17 + $0x44] sm:$0xf]  ;;  %s2071_s22 = sshra.s32 %s1179_s9, 4  ;;  %s2077_s27 = scalar_lea.hbm %s2555_s5, 32  ;;  %s2072_s22 = int_to_ptr.hbm [resolvable:$true] %s2071_s22 }
  0x93   : > { %1088 = vmatpush.bf16.msrb.mxu2 %v1585_v3  ;;  %v1485_v46 = vor.u32 %v1748_v41, %v1482_v42  ;;  %v1776_v41 = vld [vmem:[%s2323_s17 + $0x124] sm:$0xf]  ;;  %v1594_v42 = vld [vmem:[%s2323_s17 + $0x128] sm:$0xf0]  ;;  %s2073_s3 = scalar_lea.hbm %s2072_s22, 16  ;;  %p2078_p2 = scmp.lt.s32.totalorder %s2072_s22, %s2555_s5 }
  0x94   : > { %1101 = vmatpush.bf16.msrb.mxu3 %v1649_v4  ;;  %p2074_p4 = scmp.ne.s32.totalorder %s2072_s22, %s2073_s3  ;;  %p2079_p10 = scmp.lt.s32.totalorder %s2077_s27, %s2073_s3 }
  0x95   : > { %1063 = vmatpush.bf16.msrb.mxu0 %v1449_v52  ;;  %v1618_v52 = vld [vmem:[%s2323_s17 + $0x158] sm:$0xf0] }
  0x96   : > { %1076 = vmatpush.bf16.msrb.mxu1 %v1513_v56  ;;  %v1621_v54 = vor.u32 %v1782_v51, %v1618_v52  ;;  %v1682_v56 = vld [vmem:[%s2323_s17 + $0x1d8] sm:$0xf0]  ;;  %v1756_v51 = vld [vmem:[%s2323_s17 + $0x84] sm:$0xf]  ;;  %p2075_p8 = pnand %p2074_p4, %p2245_p7  ;;  %p2080_p13 = por %p2079_p10, %p2078_p2 }
  0x97   : > { %1089 = vmatpush.bf16.msrb.mxu2 %v1577_v13  ;;  %v1744_v13 = vld [vmem:[%s2323_s17 + $0x24] sm:$0xf] }
  0x98   : > { %1102 = vmatpush.bf16.msrb.mxu3 %v1641_v17  ;;  %v1469_v16 = vor.u32 %v1744_v13, %v1466_v14  ;;  %v1760_v17 = vld [vmem:[%s2323_s17 + $0xa4] sm:$0xf]  ;;  %p2076_p9 = pneg %p2075_p8 }
  0x99   : > { %1108 = vmatpush.bf16.msra.mxu0 %v1509_v57  ;;  %v1685_v57 = vor.u32 %v1798_v55, %v1682_v56  ;;  %v1514_v55 = vld [vmem:[%s2323_s17 + $0x88] sm:$0xf0] }
  0x9a   : > { %1121 = vmatpush.bf16.msra.mxu1 %v1573_v61  ;;  %p2081_p0 = pnand %p2080_p13, %p2076_p9 }
  0x9b   : > { %1134 = vmatpush.bf16.msra.mxu2 %v1637_v21  ;;  %v1533_v21 = vor.u32 %v1760_v17, %v1530_v18 }
  0x9c   : > { %1147 = vmatpush.bf16.msra.mxu3 %v1701_v22  ;;  %v1778_v22 = vld [vmem:[%s2323_s17 + $0x134] sm:$0xf] }
  0x9d   : > { %1109 = vmatpush.bf16.msra.mxu0 %v1501_v8 }
  0x9e   : > { %1122 = vmatpush.bf16.msra.mxu1 %v1565_v12  ;;  %v1677_v12 = vor.u32 %v1796_v7, %v1674_v10  ;;  %v1772_v7 = vld [vmem:[%s2323_s17 + $0x104] sm:$0xf] }
  0x9f   : > { %1135 = vmatpush.bf16.msra.mxu2 %v1629_v36 }
  0xa0   : > { %1148 = vmatpush.bf16.msra.mxu3 %v1693_v40 }
  0xa1   : > { %1110 = vmatpush.bf16.msra.mxu0 %v1493_v27  ;;  %v1794_v27 = vld [vmem:[%s2323_s17 + $0x1b4] sm:$0xf] }
  0xa2   : > { %1123 = vmatpush.bf16.msra.mxu1 %v1557_v31  ;;  %v1669_v32 = vor.u32 %v1794_v27, %v1666_v28 }
  0xa3   : > { %1136 = vmatpush.bf16.msra.mxu2 %v1621_v54 }
  0xa4   : > { %1149 = vmatpush.bf16.msra.mxu3 %v1685_v57  ;;  %v1517_v57 = vor.u32 %v1756_v51, %v1514_v55 }
  0xa5   : > { %1111 = vmatpush.bf16.msra.mxu0 %v1485_v46  ;;  %v1658_v46 = vld [vmem:[%s2323_s17 + $0x1a8] sm:$0xf0] }
  0xa6   : > { %1124 = vmatpush.bf16.msra.mxu1 %v1549_v50  ;;  %v1450_v50 = vld [vmem:[%s2323_s17 + $0x8] sm:$0xf0] }
  0xa7   : > { %1137 = vmatpush.bf16.msra.mxu2 %v1613_v9 }
  0xa8   : > { %1150 = vmatpush.bf16.msra.mxu3 %v1677_v12  ;;  %v1642_v12 = vld [vmem:[%s2323_s17 + $0x188] sm:$0xf0] }
  0xa9   : > { %1112 = vmatpush.bf16.msra.mxu0 %v1477_v0 }
  0xac   : > { %1151 = vmatpush.bf16.msra.mxu3 %v1669_v32 }
  0xad   : > { %1113 = vmatpush.bf16.msra.mxu0 %v1469_v16 }
  0xf5   : > { %v543_v26 = vpop.f32.mrf.mxu0 }
  0xf6   : > { %v2413_v29 = vadd.f32 %v543_v26, %v366_v1  ;;  %v556_v30 = vpop.f32.mrf.mxu1  ;;  %v1538_v1 = vld [vmem:[%s2323_s17 + $0xb8] sm:$0xf0]  ;;  %v1605_v26 = vor.u32 %v1778_v22, %v1602_v23 }
  0xf7   : > { %v2418_v35 = vadd.f32 %v556_v30, %v367_v2  ;;  %v1541_v4 = vor.u32 %v1762_v60, %v1538_v1  ;;  %v1586_v1 = vld [vmem:[%s2323_s17 + $0x118] sm:$0xf0] }
  0xf8   : > { %v586_v38 = vsub.f32 0.0, %v2413_v29  ;;  %1138 = vmatpush.bf16.msra.mxu2 %v1605_v26 }
  0xf9   : > { %v587_v43 = vsub.f32 0.0, %v2418_v35  ;;  %1125 = vmatpush.bf16.msra.mxu1 %v1541_v4  ;;  %v1650_v4 = vld [vmem:[%s2323_s17 + $0x198] sm:$0xf0] }
  0xfa   : > { %v590_v49 = vmul.f32 1.442695, %v586_v38  ;;  %v1522_v38 = vld [vmem:[%s2323_s17 + $0x98] sm:$0xf0] }
  0xfb   : > { %v592_v53 = vmul.f32 1.442695, %v587_v43  ;;  %v1525_v40 = vor.u32 %v1758_v37, %v1522_v38  ;;  %v1597_v43 = vor.u32 %v1776_v41, %v1594_v42 }
  0xfc   : > { %1891 = vpow2.f32 %v590_v49  ;;  %v1740_v49 = vld [vmem:[%s2323_s17 + $0x4] sm:$0xf] }
  0xfd   : > { %v569_v45 = vpop.f32.mrf.mxu2  ;;  %1893 = vpow2.f32 %v592_v53  ;;  %v545_v63 = vpop.f32.mrf.mxu0  ;;  %1126 = vmatpush.bf16.msra.mxu1 %v1533_v21  ;;  %1139 = vmatpush.bf16.msra.mxu2 %v1597_v43  ;;  %v1453_v54 = vor.u32 %v1740_v49, %v1450_v50 }
  0xfe   : > { %v2436_v61 = vadd.f32 %v569_v45, %v368_v39  ;;  %v582_v62 = vpop.f32.mrf.mxu3  ;;  %v558_v3 = vpop.f32.mrf.mxu1  ;;  %v1461_v39 = vor.u32 %v1742_v33, %v1458_v34  ;;  %v1774_v63 = vld [vmem:[%s2323_s17 + $0x114] sm:$0xf] }
  0xff   : > { %v2439_v2 = vadd.f32 %v582_v62, %v369_v44  ;;  %v1792_v44 = vld [vmem:[%s2323_s17 + $0x1a4] sm:$0xf]  ;;  %v1790_v3 = vld [vmem:[%s2323_s17 + $0x194] sm:$0xf]  ;;  %v1589_v14 = vor.u32 %v1774_v63, %v1586_v1 }
 0x100   : > { %v588_v8 = vsub.f32 0.0, %v2436_v61  ;;  %1114 = vmatpush.bf16.msra.mxu0 %v1461_v39  ;;  %v1661_v48 = vor.u32 %v1792_v44, %v1658_v46 }
 0x101   : > { %v589_v11 = vsub.f32 0.0, %v2439_v2  ;;  %1127 = vmatpush.bf16.msra.mxu1 %v1525_v40  ;;  %1140 = vmatpush.bf16.msra.mxu2 %v1589_v14 }
 0x102   : > { %v594_v15 = vmul.f32 1.442695, %v588_v8  ;;  %v1892_v19 = vpop.eup %1891  ;;  %1152 = vmatpush.bf16.msra.mxu3 %v1661_v48  ;;  %v1578_v8 = vld [vmem:[%s2323_s17 + $0x108] sm:$0xf0] }
 0x103   : > { %v596_v20 = vmul.f32 1.442695, %v589_v11  ;;  %v1894_v24 = vpop.eup %1893  ;;  %v2453_v25 = vadd.f32 1.0, %v1892_v19  ;;  %v1788_v11 = vld [vmem:[%s2323_s17 + $0x184] sm:$0xf]  ;;  %v1581_v21 = vor.u32 %v1772_v7, %v1578_v8 }
 0x104   : > { %1895 = vpow2.f32 %v594_v15  ;;  %v2457_v30 = vadd.f32 1.0, %v1894_v24  ;;  %1115 = vmatpush.bf16.msra.mxu0 %v1453_v54  ;;  %v1653_v15 = vor.u32 %v1790_v3, %v1650_v4  ;;  %v1645_v22 = vor.u32 %v1788_v11, %v1642_v12 }
 0x105   : > { %1897 = vpow2.f32 %v596_v20  ;;  %v571_v31 = vpop.f32.mrf.mxu2  ;;  %v611_v60 = vand.u32 2147483647, %v2453_v25  ;;  %1128 = vmatpush.bf16.msra.mxu1 %v1517_v57  ;;  %vm607_vm0 = vweird.f32 %v2453_v25  ;;  %v613_v9 = vand.u32 2147483648, %v2453_v25  ;;  %1141 = vmatpush.bf16.msra.mxu2 %v1581_v21  ;;  %v730_v57 = vld [vmem:[%s294_s28] sm:$0x3] }
 0x106   : > { %1899 = vrcp.f32 %v2453_v25  ;;  %v584_v36 = vpop.f32.mrf.mxu3  ;;  %v625_v62 = vand.u32 2147483647, %v2457_v30  ;;  %v627_v6 = vand.u32 2147483648, %v2457_v30  ;;  %vm621_vm1 = vweird.f32 %v2457_v30  ;;  %1153 = vmatpush.bf16.msra.mxu3 %v1653_v15 }
 0x107   : > { %1901 = vrcp.f32 %v2457_v30  ;;  %v614_v23 = vor.u32 1.1754944e-38, %v613_v9  ;;  %vm612_vm7 = vcmp.eq.f32.partialorder %v611_v60, 8.507059e+37 }
 0x108   : > { %v628_v20 = vor.u32 1.1754944e-38, %v627_v6  ;;  %vm626_vm6 = vcmp.eq.f32.partialorder %v625_v62, 8.507059e+37  ;;  %v733_v6 = vperm.slane %v730_v57, 1 }
 0x10a   : > { %v1896_v47 = vpop.eup %1895  ;;  %1154 = vmatpush.bf16.msra.mxu3 %v1645_v22 }
 0x10b   : > { %v1898_v52 = vpop.eup %1897  ;;  %v2472_v53 = vadd.f32 1.0, %v1896_v47 }
 0x10c   : > { %v1900_v56 = vpop.eup %1899  ;;  %v2475_v45 = vadd.f32 1.0, %v1898_v52 }
 0x10d   : > { %v1902_v58 = vpop.eup %1901  ;;  %v603_v59 = vmul.f32 %v1900_v56, %v2453_v25  ;;  %1903 = vrcp.f32 %v2472_v53  ;;  %vm608_vm3 = vweird.f32 %v1900_v56  ;;  %v639_v25 = vand.u32 2147483647, %v2472_v53 }
 0x10e   : > { %v617_v0 = vmul.f32 %v1902_v58, %v2457_v30  ;;  %1905 = vrcp.f32 %v2475_v45  ;;  %vm622_vm2 = vweird.f32 %v1902_v58  ;;  %vm609_vm5 = vmor %vm607_vm0, %vm608_vm3  ;;  %v641_v37 = vand.u32 2147483648, %v2472_v53 }
 0x10f   : > { %v604_v5 = vsub.f32 1.0, %v603_v59  ;;  %vm2495_vm4 = vmor %vm621_vm1, %vm622_vm2  ;;  %vm635_vm9 = vweird.f32 %v2472_v53  ;;  %v653_v42 = vand.u32 2147483647, %v2475_v45  ;;  %v655_v43 = vand.u32 2147483648, %v2475_v45 }
 0x110   : > { %v618_v10 = vsub.f32 1.0, %v617_v0  ;;  %v642_v47 = vor.u32 1.1754944e-38, %v641_v37  ;;  %vm640_vm12 = vcmp.eq.f32.partialorder %v639_v25, 8.507059e+37  ;;  %vm649_vm13 = vweird.f32 %v2475_v45 }
 0x111   : > { %v605_v13 = vmul.f32 %v1900_v56, %v604_v5  ;;  %v656_v50 = vor.u32 1.1754944e-38, %v655_v43  ;;  %vm654_vm15 = vcmp.eq.f32.partialorder %v653_v42, 8.507059e+37 }
 0x112   : > { %v619_v16 = vmul.f32 %v1902_v58, %v618_v10 }
 0x113   : > { %v1904_v17 = vpop.eup %1903  ;;  %v606_v18 = vadd.f32 %v1900_v56, %v605_v13 }
 0x114   : > { %v620_v24 = vadd.f32 %v1902_v58, %v619_v16  ;;  %v631_v26 = vmul.f32 %v1904_v17, %v2472_v53  ;;  %v1906_v27 = vpop.eup %1905  ;;  %vm636_vm8 = vweird.f32 %v1904_v17 }
 0x115   : > { %v610_v28 = vsel %vm609_vm5, %v1900_v56, %v606_v18  ;;  %v645_v33 = vmul.f32 %v1906_v27, %v2475_v45  ;;  %vm650_vm10 = vweird.f32 %v1906_v27  ;;  %vm637_vm11 = vmor %vm635_vm9, %vm636_vm8 }
 0x116   : > { %v615_v30 = vsel %vm612_vm7, %v614_v23, %v610_v28  ;;  %v624_v31 = vsel %vm2495_vm4, %v1902_v58, %v620_v24  ;;  %v632_v32 = vsub.f32 1.0, %v631_v26  ;;  %vm651_vm14 = vmor %vm649_vm13, %vm650_vm10 }
 0x117   : > { %v658_v34 = vmul.f32 %v615_v30, %v2413_v29  ;;  %v629_v36 = vsel %vm626_vm6, %v628_v20, %v624_v31  ;;  %v646_v40 = vsub.f32 1.0, %v645_v33 }
 0x118   : > { %v659_v38 = vmul.f32 %v629_v36, %v2418_v35  ;;  %v633_v39 = vmul.f32 %v1904_v17, %v632_v32 }
 0x119   : > { %v662_v41 = vpack.c.bf16 %v658_v34, %v658_v34  ;;  %v647_v46 = vmul.f32 %v1906_v27, %v646_v40 }
 0x11a   : > { %v663_v29 = vpack.c.bf16 %v659_v38, %v659_v38  ;;  %v634_v44 = vadd.f32 %v1904_v17, %v633_v39 }
 0x11b   : > { %1064 = vmatmul.bf16.vlgmr.msrb.gmra.mxu0 %v662_v41  ;;  %v648_v35 = vadd.f32 %v1906_v27, %v647_v46 }
 0x11c   : > { %v638_v48 = vsel %vm637_vm11, %v1904_v17, %v634_v44  ;;  %1077 = vmatmul.bf16.vlgmr.msrb.gmra.mxu1 %v663_v29 }
 0x11d   : > { %v643_v49 = vsel %vm640_vm12, %v642_v47, %v638_v48  ;;  %v652_v52 = vsel %vm651_vm14, %v1906_v27, %v648_v35 }
 0x11e   : > { %v660_v51 = vmul.f32 %v643_v49, %v2436_v61  ;;  %v657_v53 = vsel %vm654_vm15, %v656_v50, %v652_v52  ;;  %v732_v61 = vperm.slane %v730_v57, 0 }
 0x11f   : > { %v661_v55 = vmul.f32 %v657_v53, %v2439_v2 }
 0x120   : > { %v664_v54 = vpack.c.bf16 %v660_v51, %v660_v51 }
 0x121   : > { %v665_v56 = vpack.c.bf16 %v661_v55, %v661_v55 }
 0x122   : > { %1090 = vmatmul.bf16.vlgmr.msrb.gmra.mxu2 %v664_v54 }
 0x123   : > { %1103 = vmatmul.bf16.vlgmr.msrb.gmra.mxu3 %v665_v56 }
 0x12b   : > { %1116 = vmatmul.bf16.vlgmr.msra.gmra.mxu0 %v662_v41 }
 0x12c   : > { %1129 = vmatmul.bf16.vlgmr.msra.gmra.mxu1 %v663_v29 }
 0x132   : > { %1142 = vmatmul.bf16.vlgmr.msra.gmra.mxu2 %v664_v54 }
 0x133   : > { %1155 = vmatmul.bf16.vlgmr.msra.gmra.mxu3 %v665_v56 }
 0x198   : > { %v1065_v45 = vpop.f32.mrf.mxu0 }
 0x199   : > { %v1078_v58 = vpop.f32.mrf.mxu1  ;;  %v1066_v59 = vadd.f32 %v1065_v45, %v732_v61 }
 0x19b   : > { %v1079_v63 = vadd.f32 %v1078_v58, %v1066_v59 }
 0x1a0   : > { %v1067_v60 = vpop.f32.mrf.mxu0 }
 0x1a1   : > { %v1080_v62 = vpop.f32.mrf.mxu1 }
 0x1a5   : > { %v1091_v2 = vpop.f32.mrf.mxu2 }
 0x1a6   : > { %v1092_v0 = vadd.f32 %v1091_v2, %v1079_v63  ;;  %v1104_v1 = vpop.f32.mrf.mxu3 }
 0x1a8   : > { %v1105_v3 = vadd.f32 %v1104_v1, %v1092_v0  ;;  %v1117_v4 = vpop.f32.mrf.mxu0 }
 0x1a9   : > { %v1130_v5 = vpop.f32.mrf.mxu1  ;;  %v1118_v9 = vadd.f32 %v1117_v4, %v733_v6 }
 0x1aa   : > { %1160 = vst [vmem:[%s326_s0] sm:$0xff] %v1105_v3 }
 0x1ab   : > { %v1131_v12 = vadd.f32 %v1130_v5, %v1118_v9 }
 0x1ad   : > { %v1093_v7 = vpop.f32.mrf.mxu2 }
 0x1ae   : > { %v1106_v8 = vpop.f32.mrf.mxu3 }
 0x1b0   : > { %v1119_v10 = vpop.f32.mrf.mxu0 }
 0x1b1   : > { %v1132_v11 = vpop.f32.mrf.mxu1 }
 0x1b5   : > { %v1143_v13 = vpop.f32.mrf.mxu2 }
 0x1b6   : > { %v1144_v14 = vadd.f32 %v1143_v13, %v1131_v12  ;;  %v1156_v15 = vpop.f32.mrf.mxu3 }
 0x1b8   : > { %v1157_v16 = vadd.f32 %v1156_v15, %v1144_v14 }
 0x1ba   : > { %1161 = vst [vmem:[%s326_s0 + $0x8] sm:$0xff] %v1157_v16 }
 0x1bb   : > { %2084 = shalt.err (!%p2081_p0)
}
 0x1bc   : > { %1821 = dma.vmem_to_hbm [thread:$0]  (%p2245_p7), %s1177_s23, 256, %s1179_s9, %s1163_s16  }
 0x1bd   : > { %v1145_v17 = vpop.f32.mrf.mxu2 }
 0x1be   : > { %v1158_v18 = vpop.f32.mrf.mxu3 }
 0x1bf PF: > { %s1190_s1 = sand.u32 1, %s2119_s18   ;;  %p2583_p3 = scmp.ge.s32.totalorder %s2131_s21, 2 }
 0x1c0   : > { %s1191_s29 = scalar_lea.sflag [#allocation4], %s1190_s1 }
 0x1c1   : > { %p1841_p12 = pnand %p2583_p3, %p2205_p6 }
 0x1c3   : > { %p1842_p5 = pneg %p1841_p12 }
 0x1c5   : > { %2114 = dma.done.wait (%p1842_p5), %s1191_s29, 256  }
 0x1c6   : > { %2116 = vsyncadd (%p1842_p5), %s1191_s29, 4294967040  ;;  %s2584_s21 = sld [smem:[#allocation16_spill]]  ;;  %s2586_s18 = smov %s2123_s19 }
 0x1c7   : > { %s2585_s11 = sld [smem:[#allocation17_spill]]  ;;  %s2587_s19 = smov %s2127_s20 }
 0x1cc   : > { %p20_p7 = scmp.ge.s32.totalorder %s2584_s21, 4  }
 0x1cd   : > { %s2588_s20 = smov %s2585_s11 }
 0x1ce   :  { %22 = sbr.rel (!%p20_p7) target bundleno = 11 (0xb), region = 109 }
 0x1d3   :  { %1197 = vsyncpa [#allocation3], 1 }
 0x1d4   :  { %1199 = vsyncpa [#allocation3 + $0x1], 1 }
 0x1d5   :  { %1200 = vsyncpa [#allocation6], 1 }
 0x1d6   :  { %1201 = vsyncpa [#allocation9], 1 }
 0x1d7   :  { %1203 = vsyncpa [#allocation9 + $0x1], 1 }
 0x1d8   :  { %1204 = vsyncpa [#allocation4], 1 }
 0x1d9   :  { %1206 = vsyncpa [#allocation4 + $0x1], 1 }

</bundles_post_ra>
